<compile_context>
chip_gen: v6e
topology: v6e:2x2x1
jax: 0.10.0
libtpu: 0.0.40
codegen_flags: <defaults>
</compile_context>

<pallas_src>
import functools

import jax
import jax.numpy as jnp
import numpy as np
from jax import lax
from jax.experimental import pallas as pl
from jax.experimental.pallas import tpu as pltpu


# ---------------------------------------------------------------------------
# keypoints -> heatmap targets (plain JAX: only SigmaP*K elements, a Pallas
# kernel here is launch-overhead-dominated and lane-sparse).
# ---------------------------------------------------------------------------
def keypoints_to_heatmap(kp, boxes, m):
    """kp: (P, K, 3) = (y, x, vis);  boxes: (P, 4) = (y1, x1, y2, x2)."""
    y, x, vis = kp[..., 0], kp[..., 1], kp[..., 2]
    off_y, off_x = boxes[:, None, 0], boxes[:, None, 1]
    y2, x2 = boxes[:, None, 2], boxes[:, None, 3]

    # Explicitly reject degenerate boxes so no inf/NaN reaches the int cast
    # (the PyTorch reference leaves this latent/undefined).
    nondeg = (y2 > off_y) & (x2 > off_x)
    scale_y = jnp.where(nondeg, m / jnp.maximum(y2 - off_y, 1e-12), 0.0)
    scale_x = jnp.where(nondeg, m / jnp.maximum(x2 - off_x, 1e-12), 0.0)

    yb = jnp.floor((y - off_y) * scale_y).astype(jnp.int32)
    xb = jnp.floor((x - off_x) * scale_x).astype(jnp.int32)
    yb = jnp.where(y == y2, m - 1, yb)
    xb = jnp.where(x == x2, m - 1, xb)

    valid = (xb >= 0) & (yb >= 0) & (xb < m) & (yb < m) & (vis > 0) & nondeg
    lin = jnp.where(valid, yb * m + xb, 0)
    return lin, valid


# ---------------------------------------------------------------------------
# Pallas kernel: masked cross-entropy partials over (R, L) logits.
# Each grid step (one row tile) writes its own (sum, count) partial into a
# lane-aligned (1, 8, 128) block -> no cross-step state, fully parallel grid.
# targets carry a -1 sentinel for invalid / padded / overhang rows.
# ---------------------------------------------------------------------------
def _ce_partial_kernel(logits_ref, tgt_ref, out_ref):
    z = logits_ref[...].astype(jnp.float32)          # (TR, L)
    t = tgt_ref[...]                                 # (TR, 1) int32, -1 == invalid
    v = t >= 0                                       # (TR, 1) bool

    m = jnp.max(z, axis=-1, keepdims=True)
    lse = m + jnp.log(jnp.sum(jnp.exp(z - m), axis=-1, keepdims=True))
    # (1, L) lane iota broadcast against t: no (TR, L) iota materialization.
    col = lax.broadcasted_iota(jnp.int32, (1, z.shape[1]), 1)
    z_t = jnp.sum(jnp.where(col == t, z, 0.0), axis=-1, keepdims=True)
    ce = lse - z_t                                   # (TR, 1)

    # where-guard: overhang rows of the last tile read garbage logits but have
    # t == -1 (sentinel), so they contribute exactly 0 (select: NaN/Inf in the
    # unselected branch does not propagate).
    s = jnp.sum(jnp.where(v, ce, 0.0))
    c = jnp.sum(v.astype(jnp.float32))

    sub = lax.broadcasted_iota(jnp.int32, out_ref.shape, 1)     # (1, 8, 128)
    out_ref[...] = jnp.where(sub == 0, s, jnp.where(sub == 1, c, 0.0))


def masked_cross_entropy(logits2d, targets, *, row_tile=512):
    """logits2d: (R, L).  targets: (R,) int32 with -1 marking invalid rows."""
    r, l = logits2d.shape

    # row_tile policy:
    #   * multiple of 16 (bf16-friendly sublane packing, satisfies (8, .))
    #   * clamped so the grid has >= 2 steps whenever R allows it (v7x: 2 TCs
    #     + "parallel" grid axis)
    #   * default 512: 2 buffers x 512 x 3136 x 4 B ~= 12.8 MiB, inside every
    #     generation's scoped-VMEM budget.
    def _round_up(v, a):
        return ((v + a - 1) // a) * a

    row_tile = min(row_tile, max(16, _round_up(pl.cdiv(r, 2), 16)))
    row_tile = max(16, _round_up(row_tile, 16))
    num_tiles = pl.cdiv(r, row_tile)
    r_pad = num_tiles * row_tile

    # Only the tiny 1-D target array is padded; the (R, L) logits are NOT
    # copied/padded in HBM (edge blocks handle the overhang).
    tgt = jnp.pad(targets.astype(jnp.int32), (0, r_pad - r),
                  constant_values=-1).reshape(r_pad, 1)

    itemsize = int(jnp.dtype(logits2d.dtype).itemsize)
    vmem_est = (2 * row_tile * l * itemsize          # double-buffered logits
                + 2 * row_tile * 4                   # targets
                + 2 * 8 * 128 * 4)                   # partial output blocks
    vmem_limit = int(min(max(2 * vmem_est, 16 << 20), 48 << 20))
    cost = pl.CostEstimate(
        flops=int(6 * r * l),
        transcendentals=int(r * l + r),
        bytes_accessed=int(r * l * itemsize + r_pad * 4
                           + num_tiles * 8 * 128 * 4))

    partials = pl.pallas_call(
        _ce_partial_kernel,
        out_shape=jax.ShapeDtypeStruct((num_tiles, 8, 128), jnp.float32),
        grid_spec=pltpu.PrefetchScalarGridSpec(
            num_scalar_prefetch=0,
            grid=(num_tiles,),
            in_specs=[pl.BlockSpec((row_tile, l), lambda i: (i, 0)),
                      pl.BlockSpec((row_tile, 1), lambda i: (i, 0))],
            out_specs=pl.BlockSpec((1, 8, 128), lambda i: (i, 0, 0)),
        ),
        compiler_params=pltpu.CompilerParams(
            dimension_semantics=("parallel",),
            vmem_limit_bytes=vmem_limit),
        cost_estimate=cost,
    )(logits2d, tgt)

    total = jnp.sum(partials[:, 0, 0])
    cnt = jnp.sum(partials[:, 1, 0])
    # "no valid keypoints" edge case -> 0.0 (== keypoint_logits.sum() * 0)
    return jnp.where(cnt > 0.0, total / jnp.maximum(cnt, 1.0),
                     jnp.zeros((), jnp.float32))


# ---------------------------------------------------------------------------
# Module equivalent: KeypointRCNNLossComputation.forward
# ---------------------------------------------------------------------------
def keypoint_rcnn_loss(proposals, keypoint_logits, discretization_size, *,
                       row_tile=512):
    """proposals: list of dicts with 'keypoints' (P,K,3) and 'boxes' (P,4)."""
    if not proposals:
        return jnp.zeros((), jnp.float32)

    kp_all = jnp.concatenate([p["keypoints"] for p in proposals], axis=0)
    box_all = jnp.concatenate([p["boxes"] for p in proposals], axis=0)
    if kp_all.size == 0:
        return jnp.zeros((), jnp.float32)

    hm, valid = keypoints_to_heatmap(kp_all, box_all, discretization_size)
    keypoint_targets = hm.reshape(-1)     # matches concat of per-image .view(-1)
    valid = valid.reshape(-1)
    # Merge target + valid into one int32 side array: -1 sentinel == invalid.
    targets = jnp.where(valid, keypoint_targets, -1).astype(jnp.int32)

    n, k = keypoint_logits.shape[:2]
    l = int(np.prod(keypoint_logits.shape[2:]))
    logits2d = keypoint_logits.reshape(n * k, l)

    return masked_cross_entropy(logits2d, targets, row_tile=row_tile)


# ---------------------------------------------------------------------------
# Plain-JAX reference for the masked-mean CE (take_along_axis gather).
# ---------------------------------------------------------------------------
def _reference_loss(logits2d, targets, valid):
    z = logits2d.astype(jnp.float32)
    m = jnp.max(z, axis=-1, keepdims=True)
    lse = (m + jnp.log(jnp.sum(jnp.exp(z - m), axis=-1, keepdims=True)))[:, 0]
    z_t = jnp.take_along_axis(z, targets[:, None].astype(jnp.int32), axis=1)[:, 0]
    ce = lse - z_t
    vmask = valid.astype(jnp.float32)
    cnt = jnp.sum(vmask)
    return jnp.where(cnt > 0, jnp.sum(vmask * ce) / jnp.maximum(cnt, 1.0), 0.0)


if __name__ == "__main__":
    key = jax.random.PRNGKey(0)
    M = 8            # discretization_size (heatmap side)
    K = 4            # keypoints per instance
    P = 3            # proposals per image
    N_IMAGES = 2

    img_keys = jax.random.split(key, N_IMAGES + 1)
    proposals = []
    for i in range(N_IMAGES):
        k1, k2, k3, k4 = jax.random.split(img_keys[i], 4)
        y1x1 = jax.random.uniform(k1, (P, 2), minval=0.0, maxval=20.0)
        wh = jax.random.uniform(k2, (P, 2), minval=8.0, maxval=30.0)
        boxes = jnp.concatenate([y1x1, y1x1 + wh], axis=1)       # (P,4) y1x1y2x2
        u = jax.random.uniform(k3, (P, K, 2), minval=-0.1, maxval=1.1)
        y = boxes[:, None, 0] + u[..., 0] * (boxes[:, None, 2] - boxes[:, None, 0])
        x = boxes[:, None, 1] + u[..., 1] * (boxes[:, None, 3] - boxes[:, None, 1])
        vis = (jax.random.uniform(k4, (P, K)) > 0.2).astype(jnp.float32)
        kp = jnp.stack([y, x, vis], axis=-1)                     # (P,K,3)
        proposals.append({"keypoints": kp, "boxes": boxes})

    n_total = N_IMAGES * P
    keypoint_logits = jax.random.normal(img_keys[-1], (n_total, K, M, M),
                                        dtype=jnp.float32)

    # R = 24 rows, row_tile clamps to 16 -> 2 grid steps, last tile has an
    # 8-row overhang: exercises the edge-block / sentinel-mask path.
    loss = keypoint_rcnn_loss(proposals, keypoint_logits, M)
    loss = jax.block_until_ready(loss)

    # sanity check against a plain-JAX recomputation of the same semantics
    kp_all = jnp.concatenate([p["keypoints"] for p in proposals], axis=0)
    box_all = jnp.concatenate([p["boxes"] for p in proposals], axis=0)
    hm_ref, valid_ref = keypoints_to_heatmap(kp_all, box_all, M)
    ref = _reference_loss(keypoint_logits.reshape(n_total * K, M * M),
                          hm_ref.reshape(-1), valid_ref.reshape(-1))
    np.testing.assert_allclose(np.asarray(loss), np.asarray(ref),
                               rtol=1e-4, atol=1e-5)

    print("KERNEL_OK")
</pallas_src>

<mosaic_0001>
module attributes {stable_mosaic.version = 11 : i64} {
  func.func @_ce_partial_kernel(%arg0: i32, %arg1: memref<16x64xf32, #tpu.memory_space<vmem>>, %arg2: memref<16x1xi32, #tpu.memory_space<vmem>>, %arg3: memref<1x8x128xf32, #tpu.memory_space<vmem>>) attributes {dimension_semantics = [#tpu.dimension_semantics<parallel>], iteration_bounds = array<i64: 2>, scalar_prefetch = 0 : i64, scratch_operands = 0 : i64, tpu.core_type = #tpu.core_type<tc>, window_params = [{transform_indices = @transform_0, window_bounds = array<i64: 16, 64>}, {transform_indices = @transform_1, window_bounds = array<i64: 16, 1>}, {transform_indices = @transform_2, window_bounds = array<i64: 1, 8, 128>}]} {
    %c0 = arith.constant 0 : index
    %c0_0 = arith.constant 0 : index
    %0 = vector.load %arg1[%c0, %c0_0] : memref<16x64xf32, #tpu.memory_space<vmem>>, vector<16x64xf32>
    %c0_1 = arith.constant 0 : index
    %c0_2 = arith.constant 0 : index
    %1 = vector.load %arg2[%c0_1, %c0_2] : memref<16x1xi32, #tpu.memory_space<vmem>>, vector<16x1xi32>
    %c0_i32 = arith.constant 0 : i32
    %2 = vector.broadcast %c0_i32 : i32 to vector<16x1xi32>
    %3 = arith.cmpi sge, %1, %2 : vector<16x1xi32>
    %cst = arith.constant dense<0xFF800000> : vector<16xf32>
    %4 = vector.multi_reduction <maximumf>, %0, %cst [1] : vector<16x64xf32> to vector<16xf32>
    %5 = vector.shape_cast %4 : vector<16xf32> to vector<16x1xf32>
    %6 = vector.broadcast %5 : vector<16x1xf32> to vector<16x64xf32>
    %7 = arith.subf %0, %6 : vector<16x64xf32>
    %8 = math.exp %7 : vector<16x64xf32>
    %cst_3 = arith.constant dense<0.000000e+00> : vector<16xf32>
    %9 = vector.multi_reduction <add>, %8, %cst_3 [1] : vector<16x64xf32> to vector<16xf32>
    %10 = vector.shape_cast %9 : vector<16xf32> to vector<16x1xf32>
    %11 = math.log %10 : vector<16x1xf32>
    %12 = arith.addf %5, %11 : vector<16x1xf32>
    %13 = tpu.iota {dimensions = array<i32: 1>} : vector<1x64xi32>
    %14 = vector.broadcast %13 : vector<1x64xi32> to vector<16x64xi32>
    %15 = vector.broadcast %1 : vector<16x1xi32> to vector<16x64xi32>
    %16 = arith.cmpi eq, %14, %15 : vector<16x64xi32>
    %cst_4 = arith.constant 0.000000e+00 : f32
    %17 = vector.broadcast %cst_4 : f32 to vector<16x64xf32>
    %18 = arith.select %16, %0, %17 : vector<16x64xi1>, vector<16x64xf32>
    %cst_5 = arith.constant dense<0.000000e+00> : vector<16xf32>
    %19 = vector.multi_reduction <add>, %18, %cst_5 [1] : vector<16x64xf32> to vector<16xf32>
    %20 = vector.shape_cast %19 : vector<16xf32> to vector<16x1xf32>
    %21 = arith.subf %12, %20 : vector<16x1xf32>
    %cst_6 = arith.constant 0.000000e+00 : f32
    %22 = vector.broadcast %cst_6 : f32 to vector<16x1xf32>
    %23 = arith.select %3, %21, %22 : vector<16x1xi1>, vector<16x1xf32>
    %24 = vector.shape_cast %23 : vector<16x1xf32> to vector<1x16x1xf32>
    %cst_7 = arith.constant dense<0.000000e+00> : vector<1xf32>
    %25 = vector.multi_reduction <add>, %24, %cst_7 [1, 2] : vector<1x16x1xf32> to vector<1xf32>
    %26 = vector.shape_cast %25 : vector<1xf32> to vector<1x1x1xf32>
    %27 = vector.extract %26[0, 0, 0] : f32 from vector<1x1x1xf32>
    %28 = arith.extui %3 : vector<16x1xi1> to vector<16x1xi32>
    %29 = arith.sitofp %28 : vector<16x1xi32> to vector<16x1xf32>
    %30 = vector.shape_cast %29 : vector<16x1xf32> to vector<1x16x1xf32>
    %cst_8 = arith.constant dense<0.000000e+00> : vector<1xf32>
    %31 = vector.multi_reduction <add>, %30, %cst_8 [1, 2] : vector<1x16x1xf32> to vector<1xf32>
    %32 = vector.shape_cast %31 : vector<1xf32> to vector<1x1x1xf32>
    %33 = vector.extract %32[0, 0, 0] : f32 from vector<1x1x1xf32>
    %34 = tpu.iota {dimensions = array<i32: 1>} : vector<1x8x128xi32>
    %c0_i32_9 = arith.constant 0 : i32
    %35 = vector.broadcast %c0_i32_9 : i32 to vector<1x8x128xi32>
    %36 = arith.cmpi eq, %34, %35 : vector<1x8x128xi32>
    %c1_i32 = arith.constant 1 : i32
    %37 = vector.broadcast %c1_i32 : i32 to vector<1x8x128xi32>
    %38 = arith.cmpi eq, %34, %37 : vector<1x8x128xi32>
    %cst_10 = arith.constant 0.000000e+00 : f32
    %39 = vector.broadcast %33 : f32 to vector<1x8x128xf32>
    %40 = vector.broadcast %cst_10 : f32 to vector<1x8x128xf32>
    %41 = arith.select %38, %39, %40 : vector<1x8x128xi1>, vector<1x8x128xf32>
    %42 = vector.broadcast %27 : f32 to vector<1x8x128xf32>
    %43 = arith.select %36, %42, %41 : vector<1x8x128xi1>, vector<1x8x128xf32>
    %c0_11 = arith.constant 0 : index
    %c0_12 = arith.constant 0 : index
    %c0_13 = arith.constant 0 : index
    %44 = vector.load %arg3[%c0_11, %c0_12, %c0_13] : memref<1x8x128xf32, #tpu.memory_space<vmem>>, vector<1x8x128xf32>
    tpu.vector_store %arg3[%c0_11, %c0_12, %c0_13], %43 {strides = array<i32>} : memref<1x8x128xf32, #tpu.memory_space<vmem>>, vector<1x8x128xf32>,
    return
  }
  func.func @transform_0(%arg0: i32) -> (i32, i32) {
    %c0_i32 = arith.constant 0 : i32
    %c0_i32_0 = arith.constant 0 : i32
    return %arg0, %c0_i32 : i32, i32
  }
  func.func @transform_1(%arg0: i32) -> (i32, i32) {
    %c0_i32 = arith.constant 0 : i32
    %c0_i32_0 = arith.constant 0 : i32
    return %arg0, %c0_i32 : i32, i32
  }
  func.func @transform_2(%arg0: i32) -> (i32, i32, i32) {
    %c0_i32 = arith.constant 0 : i32
    %c0_i32_0 = arith.constant 0 : i32
    %c0_i32_1 = arith.constant 0 : i32
    return %arg0, %c0_i32, %c0_i32_0 : i32, i32, i32
  }
}

</mosaic_0001>

<bundles_post_ra>
// kernel: tpu_custom_call.1
= control target key start
LH: loop header
LB: loop body
LE: loop exit
PB: predicated region body
PF: predicated region fallthrough
CT: control target
= control target key end

     0   :  { %7 = vsyncpa [#allocation3], 0  ;;  %s623_s0 = inlined_call_operand.vmem [shape: f32[24,64], index: 0, kind: input, shape index: {}]   ;;  %s624_s1 = inlined_call_operand.vmem [shape: s32[32,1], index: 1, kind: input, shape index: {}]   ;;  %s625_s2 = inlined_call_operand.hbm [shape: f32[2,8,128], index: 2, kind: output, shape index: {}]  }
   0x1   :  { %9 = vsyncpa [#allocation3 + $0x1], 0  ;;  %s512_s9 = smov 0   ;;  %s514_s10 = smov 0  }
   0x2   :  { %s516_s11 = smov 0   ;;  %s518_s12 = smov 0  }
   0x3 LB: > { %s533_s13 = sadd.s32 4294967295, %s492_s12   ;;  %s362_s14 = sadd.s32 4294967294, %s492_s12   ;;  %s492_s12 = sphi %s518_s12, %s631_s12   ;;  %s488_s11 = sphi %s516_s11, %s630_s11   ;;  %s484_s10 = sphi %s514_s10, %s629_s10   ;;  %s480_s9 = sphi %s512_s9, %s628_s9  }
   0x4   : > { %s537_s15 = sadd.s32 1, %s492_s12   ;;  %s74_s16 = sadd.s32 1, %s488_s11 }
   0x5   : > { %s71_s17 = ssub.s32 %s492_s12, %s537_s15  ;;  %p84_p0 = scmp.ne.s32.totalorder %s488_s11, %s484_s10 }
   0x6   : > { %p72_p1 = scmp.eq.s32.totalorder %s71_s17, 0  ;;  %p85_p2 = scmp.eq.s32.totalorder %s533_s13, 1 }
   0x7   : > { %p90_p3 = scmp.ne.s32.totalorder %s484_s10, %s480_s9  ;;  %p91_p4 = scmp.eq.s32.totalorder %s362_s14, 1 }
   0x8   : > { %s548_s18 = scalar_select %p72_p1, %s488_s11, %s74_s16  }
   0x9   : > { %p550_p5 = por %p85_p2, %p84_p0  ;;  %p554_p6 = por %p91_p4, %p90_p3 }
   0xa   : > { %p365_p7 = scmp.ge.s32.totalorder %s492_s12, 1  ;;  %p135_p8 = scmp.lt.s32.totalorder %s492_s12, 3 }
   0xc   : > { %p136_p9 = pnand %p365_p7, %p135_p8 }
   0xd   : > { %s367_s21 = sshll.u32 (!%p136_p9), %s533_s13, 1  ;;  %s163_s3 = sand.u32 (!%p136_p9), 1, %s484_s10  }
   0xe   : > { %139 = sbr.rel (%p136_p9) target bundleno = 568 (0x238), region = 28  ;;  %p171_p10 = scmp.lt.s32.totalorder (!%p136_p9), %s367_s21, 2 }
   0xf   : > { %p181_p11 = scmp.lt.s32.totalorder (!%p136_p9), %s367_s21, 3  ;;  %s366_s4 = sshll.u32 (!%p136_p9), %s163_s3, 3 }
  0x10   : > { %s374_s5 = sshll.u32 (!%p136_p9), %s533_s13, 7  ;;  %s165_s7 = scalar_lea.vmem (!%p136_p9), [#allocation2], %s366_s4 }
  0x11   : > { %s291_s8 = sshll.u32 (!%p136_p9), %s165_s7, 4  ;;  %s292_s8 = int_to_ptr.vmem [resolvable:$true] %s291_s8 }
  0x12   : > { %s432_s13 = scalar_lea.vmem (!%p136_p9), %s292_s8, 128 }
  0x13   : > { %v494_v0 = vmov 0   ;;  %s172_s22 = scalar_select %p171_p10, %s367_s21, 2  ;;  %vm192_vm0 = vcmask 523264   ;;  %v217_v13 = vlaneseq  ;;  %v495_v25 = vmov 0.0  }
  0x14   : > { %422 = vset.pattern.permute.xlu1 %v494_v0  ;;  %423 = vset.pattern.permute.xlu0 %v494_v0  ;;  %s633_s21 = smov (!%p181_p11, %s367_s21), 3  ;;  %vm239_vm5 = vcmask 7168   ;;  %p433_p12 = scmp.ne.s32.totalorder %s292_s8, %s432_s13 }
  0x15   : > { %s368_s23 = sshll.u32 %s172_s22, 3  ;;  %s370_s27 = sshll.u32 %s633_s21, 3  ;;  %v218_v15 = vand.u32 127, %v217_v13  ;;  %v269_v62 = vshrl.u32 %v217_v13, 7 }
  0x16   : > { %s174_s26 = scalar_lea.vmem %s623_s0, %s368_s23  ;;  %s184_s30 = scalar_lea.vmem %s624_s1, %s370_s27 }
  0x17   : > { %v186_v1 = vld [vmem:[%s174_s26] sm:$0xff]  ;;  %v187_v2 = vld [vmem:[%s174_s26 + $0x8] sm:$0xff]  ;;  %vm271_vm6 = vcmp.eq.s32.totalorder %v269_v62, 1  ;;  %vm270_vm7 = vcmp.eq.s32.totalorder %v269_v62, 0  ;;  %s588_s21 = scalar_lea.hbm %s625_s2, %s374_s5  ;;  %s278_s22 = scalar_lea.sflag [#allocation3], %s163_s3 }
  0x18   : > { %v193_v3 = vsel %vm192_vm0, %v186_v1, -inf  ;;  %v188_v4 = vld [vmem:[%s184_s30] sm:$0xff]  ;;  %v196_v5 = vsel %vm192_vm0, %v187_v2, -inf  ;;  %v189_v6 = vld [vmem:[%s184_s30 + $0x8] sm:$0xff]  ;;  %p434_p13 = pnand %p433_p12, %p550_p5  ;;  %s496_s23 = smov [#allocation2]  }
  0x19   : > { %194 = vmax.xlane.f32.xlu0 %v193_v3  ;;  %220 = vperm.xlu1 %422, %v188_v4   ;;  %vm190_vm3 = vcmp.ge.s32.totalorder %v188_v4, 0  ;;  %vm191_vm4 = vcmp.ge.s32.totalorder %v189_v6, 0  ;;  %s436_s24 = sshll.u32 %s496_s23, 4  ;;  %s437_s24 = int_to_ptr.vmem [resolvable:$false] %s436_s24 }
  0x1a   : > { %v371_v26 = vsel %vm190_vm3, 1.0, %v495_v25  ;;  %v372_v27 = vsel %vm191_vm4, 1.0, %v495_v25  ;;  %p435_p0 = pneg %p434_p13  ;;  %s438_s25 = scalar_lea.vmem %s437_s24, 256 }
  0x1b   : > { %v256_v28 = vsel %vm239_vm5, %v371_v26, 0.0  ;;  %v257_v29 = vsel %vm239_vm5, %v372_v27, 0.0  ;;  %p439_p1 = scmp.lt.s32.totalorder %s292_s8, %s437_s24  ;;  %p440_p2 = scmp.lt.s32.totalorder %s438_s25, %s432_s13 }
  0x1c   : > { %v258_v30 = vadd.f32 %v257_v29, %v256_v28 }
  0x1d   : > { %197 = vmax.xlane.f32.xlu0 %v196_v5  ;;  %223 = vperm.xlu1 %422, %v189_v6   ;;  %p441_p3 = por %p440_p2, %p439_p1 }
  0x1f   : > { %p442_p4 = pnand %p441_p3, %p435_p0 }
  0x94   : > { %v221_v14 = vpop.permute.xlu1 %220 }
  0x95   : > { %vm225_vm1 = vcmp.eq.s32.totalorder %v218_v15, %v221_v14 }
  0x96   : > { %v227_v18 = vsel %vm225_vm1, %v186_v1, 0.0 }
  0x97   : > { %v229_v20 = vsel %vm192_vm0, %v227_v18, 0.0 }
  0x98   : > { %v224_v16 = vpop.permute.xlu1 %223 }
  0x99   : > { %vm226_vm2 = vcmp.eq.s32.totalorder %v218_v15, %v224_v16 }
  0x9a   : > { %v228_v22 = vsel %vm226_vm2, %v187_v2, 0.0 }
  0x9b   : > { %v232_v24 = vsel %vm192_vm0, %v228_v22, 0.0 }
  0xa2   : > { %v195_v7 = vpop.xlane.xlu0 %194 }
  0xa3   : > { %v199_v8 = vsub.f32 %v186_v1, %v195_v7 }
  0xa5   : > { %v201_v9 = vmul.f32 1.442695, %v199_v8 }
  0xa6   : > { %v198_v10 = vpop.xlane.xlu0 %197 }
  0xa7   : > { %424 = vpow2.f32 %v201_v9  ;;  %v200_v11 = vsub.f32 %v187_v2, %v198_v10 }
  0xa9   : > { %v203_v12 = vmul.f32 1.442695, %v200_v11 }
  0xab   : > { %426 = vpow2.f32 %v203_v12 }
  0xb4   : > { %v425_v17 = vpop.eup %424 }
  0xb5   : > { %v205_v19 = vsel %vm192_vm0, %v425_v17, 0.0 }
  0xb6   : > { %206 = vadd.xlane.f32.xlu0 %v205_v19 }
  0xb8   : > { %v427_v21 = vpop.eup %426 }
  0xb9   : > { %v208_v23 = vsel %vm192_vm0, %v427_v21, 0.0 }
  0xba   : > { %209 = vadd.xlane.f32.xlu1 %v208_v23  ;;  %230 = vadd.xlane.f32.xlu0 %v229_v20 }
  0xbe   : > { %233 = vadd.xlane.f32.xlu0 %v232_v24 }
 0x13f   : > { %v207_v31 = vpop.xlane.xlu0 %206 }
 0x140   : > { %428 = vlog2.f32 %v207_v31 }
 0x143   : > { %v210_v32 = vpop.xlane.xlu1 %209  ;;  %v231_v35 = vpop.xlane.xlu0 %230 }
 0x144   : > { %430 = vlog2.f32 %v210_v32 }
 0x147   : > { %v234_v41 = vpop.xlane.xlu0 %233 }
 0x14d   : > { %v429_v33 = vpop.eup %428 }
 0x14e   : > { %v212_v34 = vmul.f32 0.6931472, %v429_v33 }
 0x150   : > { %v215_v36 = vadd.f32 %v212_v34, %v195_v7 }
 0x151   : > { %v431_v37 = vpop.eup %430 }
 0x152   : > { %v214_v38 = vmul.f32 0.6931472, %v431_v37  ;;  %v235_v39 = vsub.f32 %v215_v36, %v231_v35 }
 0x154   : > { %v216_v40 = vadd.f32 %v214_v38, %v198_v10  ;;  %v237_v42 = vsel %vm190_vm3, %v235_v39, 0.0 }
 0x155   : > { %v240_v45 = vsel %vm239_vm5, %v237_v42, 0.0 }
 0x156   : > { %v236_v43 = vsub.f32 %v216_v40, %v234_v41 }
 0x158   : > { %v238_v44 = vsel %vm191_vm4, %v236_v43, 0.0 }
 0x159   : > { %v241_v46 = vsel %vm239_vm5, %v238_v44, 0.0 }
 0x15a   : > { %v242_v47 = vadd.f32 %v241_v46, %v240_v45 }
 0x15c   : > { %243 = vadd.xlane.f32.xlu0 %v242_v47 }
 0x160   : > { %259 = vadd.xlane.f32.xlu0 %v258_v30 }
 0x1e5   : > { %v244_v48 = vpop.xlane.xlu0 %243 }
 0x1e6   : > { %v245_v49 = vrot.slane %v244_v48, 4 }
 0x1e8   : > { %v246_v50 = vadd.f32 %v245_v49, %v244_v48 }
 0x1e9   : > { %v260_v51 = vpop.xlane.xlu0 %259 }
 0x1ea   : > { %v247_v52 = vrot.slane %v246_v50, 2  ;;  %v261_v53 = vrot.slane %v260_v51, 4 }
 0x1ec   : > { %v262_v54 = vadd.f32 %v261_v53, %v260_v51  ;;  %v248_v55 = vadd.f32 %v247_v52, %v246_v50 }
 0x1ee   : > { %v263_v56 = vrot.slane %v262_v54, 2  ;;  %v249_v57 = vrot.slane %v248_v55, 1 }
 0x1f0   : > { %v264_v58 = vadd.f32 %v263_v56, %v262_v54  ;;  %v250_v59 = vadd.f32 %v249_v57, %v248_v55 }
 0x1f2   : > { %377 = vpush %v250_v59  ;;  %v265_v60 = vrot.slane %v264_v58, 1 }
 0x1f4   : > { %v266_v61 = vadd.f32 %v265_v60, %v264_v58 }
 0x1f6   : > { %379 = vpush %v266_v61 }
 0x223   : > { %s378_s6 = spop %377 }
 0x224   : > { %v274_v0 = vstv %s378_s6 }
 0x227   : > { %s380_s14 = spop %379 }
 0x228   : > { %v272_v63 = vstv %s380_s14 }
 0x229   : > { %v273_v1 = vsel %vm271_vm6, %v272_v63, 0.0 }
 0x22a   : > { %v275_v2 = vsel %vm270_vm7, %v274_v0, %v273_v1 }
 0x22b   : > { %276 = vst [vmem:[%s165_s7] sm:$0xff] %v275_v2 }
 0x22c   : > { %445 = shalt.err (!%p442_p4)
}
 0x22d   : > { %s446_s26 = scalar_lea.hbm %s588_s21, 128  ;;  %s450_s29 = scalar_lea.hbm %s625_s2, 256 }
 0x22e   : > { %p447_p7 = scmp.ne.s32.totalorder %s588_s21, %s446_s26  ;;  %p451_p10 = scmp.lt.s32.totalorder %s588_s21, %s625_s2 }
 0x22f   : > { %p452_p11 = scmp.lt.s32.totalorder %s450_s29, %s446_s26 }
 0x230   : > { %p448_p8 = pnand %p447_p7, %p550_p5 }
 0x231   : > { %p453_p12 = por %p452_p11, %p451_p10 }
 0x232   : > { %p449_p9 = pneg %p448_p8 }
 0x234   : > { %p454_p13 = pnand %p453_p12, %p449_p9 }
 0x236   : > { %457 = shalt.err (!%p454_p13)
}
 0x237   : > { %381 = dma.vmem_to_hbm [thread:$0]  (%p550_p5), %s292_s8, 128, %s588_s21, %s278_s22  }
 0x238 PF: > { %p387_p0 = scmp.ge.s32.totalorder %s492_s12, 2  ;;  %s303_s4 = sand.u32 1, %s480_s9  }
 0x239   : > { %s304_s5 = scalar_lea.sflag [#allocation3], %s303_s4 }
 0x23a   : > { %p384_p1 = pnand %p387_p0, %p554_p6 }
 0x23c   : > { %p385_p2 = pneg %p384_p1 }
 0x23e   : > { %475 = dma.done.wait (%p385_p2), %s304_s5, 128  }
 0x23f   : > { %477 = vsyncadd (%p385_p2), %s304_s5, 4294967168  ;;  %p12_p3 = scmp.ge.s32.totalorder %s537_s15, 4   ;;  %s628_s9 = smov %s484_s10 }
 0x240   : > { %s629_s10 = smov %s488_s11  ;;  %s630_s11 = smov %s548_s18 }
 0x241   : > { %s631_s12 = smov %s537_s15  ;;  %14 = sbr.rel (!%p12_p3) target bundleno = 3 (0x3), region = 66 }
 0x246   :  { %309 = vsyncpa [#allocation3], 1 }
 0x247   :  { %311 = vsyncpa [#allocation3 + $0x1], 1 }

</bundles_post_ra>
